<compile_context>
chip_gen: v7x
topology: tpu7x:2x2x1
jax: 0.10.0
libtpu: 0.0.40
codegen_flags: <defaults>
</compile_context>

<pallas_src>
import jax
import jax.numpy as jnp
from jax import lax
from jax.experimental import pallas as pl
from jax.experimental.pallas import tpu as pltpu

BN_EPS = 1e-5


def _single_layer_kernel(x_ref, gamma_ref, beta_ref, w_ref, b_ref, o_ref):
    x = x_ref[...].astype(jnp.float32)            # (N, D)
    gamma = gamma_ref[...].astype(jnp.float32)    # (1, D)
    beta = beta_ref[...].astype(jnp.float32)      # (1, D)

    # BatchNorm1d (training mode): batch mean + centered (biased) variance.
    mean = jnp.mean(x, axis=0, keepdims=True)                     # (1, D)
    centered = x - mean                                           # (N, D)
    var = jnp.mean(centered * centered, axis=0, keepdims=True)    # (1, D), >= 0

    # Fused affine + ReLU: y = max((x - mean) * (rsqrt(var+eps)*gamma) + beta, 0)
    scale = lax.rsqrt(var + BN_EPS) * gamma                       # (1, D)
    y = jnp.maximum(centered * scale + beta, 0.0)                 # (N, D)

    # Linear: weight is pre-transposed to (D, O) -> native (N,K)x(K,O) MXU dot.
    out = jnp.dot(y, w_ref[...].astype(jnp.float32),
                  preferred_element_type=jnp.float32)             # (N, O)
    out = out + b_ref[...].astype(jnp.float32)                    # (1, O) bcast
    o_ref[...] = out.astype(o_ref.dtype)


def prepare_params(gamma, beta, weight, bias):
    """One-time parameter re-layout (init-time, not per-forward).

    gamma/beta: (D,) -> (1, D); weight: (O, D) -> (D, O); bias: (O,) -> (1, O).
    """
    d = gamma.shape[0]
    o = bias.shape[0]
    return (gamma.reshape(1, d).astype(jnp.float32),
            beta.reshape(1, d).astype(jnp.float32),
            jnp.asarray(weight, jnp.float32).T,          # (D, O)
            bias.reshape(1, o).astype(jnp.float32))


@jax.jit
def single_layer_regression(x, gamma_r, beta_r, w_t, bias_r):
    """x: (N, D); gamma_r/beta_r: (1, D); w_t: (D, O); bias_r: (1, O) -> (N, O)."""
    n = x.shape[0]
    o = w_t.shape[1]
    vmem_spec = pl.BlockSpec(memory_space=pltpu.MemorySpace.VMEM)
    return pl.pallas_call(
        _single_layer_kernel,
        out_shape=jax.ShapeDtypeStruct((n, o), x.dtype),
        in_specs=[vmem_spec] * 5,
        out_specs=vmem_spec,
    )(x, gamma_r, beta_r, w_t, bias_r)


if __name__ == "__main__":
    input_dim, output_dim, batch = 10, 50, 8

    key = jax.random.PRNGKey(0)
    kx, kw, kb = jax.random.split(key, 3)

    # Deterministic inputs / params (module's __init__ shapes / PyTorch layout).
    x = jax.random.normal(kx, (batch, input_dim), dtype=jnp.float32)
    gamma = jnp.ones((input_dim,), dtype=jnp.float32)            # BN weight
    beta = jnp.zeros((input_dim,), dtype=jnp.float32)            # BN bias
    bound = 1.0 / (input_dim ** 0.5)
    weight = jax.random.uniform(kw, (output_dim, input_dim),
                                minval=-bound, maxval=bound,
                                dtype=jnp.float32)               # Linear weight
    bias = jax.random.uniform(kb, (output_dim,),
                              minval=-bound, maxval=bound,
                              dtype=jnp.float32)                 # Linear bias

    # One-time re-layout; forward path is a single pallas_call dispatch.
    gamma_r, beta_r, w_t, bias_r = prepare_params(gamma, beta, weight, bias)

    out = single_layer_regression(x, gamma_r, beta_r, w_t, bias_r)
    jax.block_until_ready(out)

    # Pure-JAX reference (training-mode BatchNorm1d -> ReLU -> Linear).
    mean = jnp.mean(x, axis=0, keepdims=True)
    var = jnp.mean((x - mean) ** 2, axis=0, keepdims=True)       # biased var
    ref = jnp.maximum((x - mean) / jnp.sqrt(var + BN_EPS) * gamma + beta, 0.0)
    ref = ref @ weight.T + bias

    assert out.shape == (batch, output_dim)
    assert jnp.allclose(out, ref, atol=1e-4, rtol=1e-4)

    print("KERNEL_OK")
</pallas_src>

<mosaic_0001>
module attributes {stable_mosaic.version = 11 : i64} {
  func.func @_single_layer_kernel(%arg0: memref<8x10xf32, #tpu.memory_space<vmem>>, %arg1: memref<1x10xf32, #tpu.memory_space<vmem>>, %arg2: memref<1x10xf32, #tpu.memory_space<vmem>>, %arg3: memref<10x50xf32, #tpu.memory_space<vmem>>, %arg4: memref<1x50xf32, #tpu.memory_space<vmem>>, %arg5: memref<8x50xf32, #tpu.memory_space<vmem>>) attributes {dimension_semantics = [], scalar_prefetch = 0 : i64, scratch_operands = 0 : i64, tpu.core_type = #tpu.core_type<tc>} {
    %c0 = arith.constant 0 : index
    %c0_0 = arith.constant 0 : index
    %0 = vector.load %arg0[%c0, %c0_0] : memref<8x10xf32, #tpu.memory_space<vmem>>, vector<8x10xf32>
    %c0_1 = arith.constant 0 : index
    %c0_2 = arith.constant 0 : index
    %1 = vector.load %arg1[%c0_1, %c0_2] : memref<1x10xf32, #tpu.memory_space<vmem>>, vector<1x10xf32>
    %c0_3 = arith.constant 0 : index
    %c0_4 = arith.constant 0 : index
    %2 = vector.load %arg2[%c0_3, %c0_4] : memref<1x10xf32, #tpu.memory_space<vmem>>, vector<1x10xf32>
    %cst = arith.constant dense<0.000000e+00> : vector<10xf32>
    %3 = vector.multi_reduction <add>, %0, %cst [0] : vector<8x10xf32> to vector<10xf32>
    %4 = vector.shape_cast %3 : vector<10xf32> to vector<1x10xf32>
    %cst_5 = arith.constant 8.000000e+00 : f32
    %5 = vector.broadcast %cst_5 : f32 to vector<1x10xf32>
    %6 = arith.divf %4, %5 : vector<1x10xf32>
    %7 = vector.broadcast %6 : vector<1x10xf32> to vector<8x10xf32>
    %8 = arith.subf %0, %7 : vector<8x10xf32>
    %9 = arith.mulf %8, %8 : vector<8x10xf32>
    %cst_6 = arith.constant dense<0.000000e+00> : vector<10xf32>
    %10 = vector.multi_reduction <add>, %9, %cst_6 [0] : vector<8x10xf32> to vector<10xf32>
    %11 = vector.shape_cast %10 : vector<10xf32> to vector<1x10xf32>
    %cst_7 = arith.constant 8.000000e+00 : f32
    %12 = vector.broadcast %cst_7 : f32 to vector<1x10xf32>
    %13 = arith.divf %11, %12 : vector<1x10xf32>
    %cst_8 = arith.constant 9.99999974E-6 : f32
    %14 = vector.broadcast %cst_8 : f32 to vector<1x10xf32>
    %15 = arith.addf %13, %14 : vector<1x10xf32>
    %16 = math.rsqrt %15 : vector<1x10xf32>
    %17 = arith.mulf %16, %1 : vector<1x10xf32>
    %18 = vector.broadcast %17 : vector<1x10xf32> to vector<8x10xf32>
    %19 = arith.mulf %8, %18 : vector<8x10xf32>
    %20 = vector.broadcast %2 : vector<1x10xf32> to vector<8x10xf32>
    %21 = arith.addf %19, %20 : vector<8x10xf32>
    %cst_9 = arith.constant 0.000000e+00 : f32
    %22 = vector.broadcast %cst_9 : f32 to vector<8x10xf32>
    %23 = arith.maximumf %21, %22 : vector<8x10xf32>
    %c0_10 = arith.constant 0 : index
    %c0_11 = arith.constant 0 : index
    %24 = vector.load %arg3[%c0_10, %c0_11] : memref<10x50xf32, #tpu.memory_space<vmem>>, vector<10x50xf32>
    %cst_12 = arith.constant dense<0.000000e+00> : vector<8x50xf32>
    %25 = tpu.matmul %23, %24, %cst_12 {dimension_numbers = #tpu.dot_dimension_numbers<[1], [0], [0], [1], [0, 0, 1, 1], [], []>} : vector<8x10xf32>, vector<10x50xf32>, vector<8x50xf32> -> vector<8x50xf32>
    %c0_13 = arith.constant 0 : index
    %c0_14 = arith.constant 0 : index
    %26 = vector.load %arg4[%c0_13, %c0_14] : memref<1x50xf32, #tpu.memory_space<vmem>>, vector<1x50xf32>
    %27 = vector.broadcast %26 : vector<1x50xf32> to vector<8x50xf32>
    %28 = arith.addf %25, %27 : vector<8x50xf32>
    %c0_15 = arith.constant 0 : index
    %c0_16 = arith.constant 0 : index
    %29 = vector.load %arg5[%c0_15, %c0_16] : memref<8x50xf32, #tpu.memory_space<vmem>>, vector<8x50xf32>
    tpu.vector_store %arg5[%c0_15, %c0_16], %28 {strides = array<i32>} : memref<8x50xf32, #tpu.memory_space<vmem>>, vector<8x50xf32>,
    return
  }
}

</mosaic_0001>

<bundles_post_ra>
// kernel: single_layer_regression.1
= control target key start
LH: loop header
LB: loop body
LE: loop exit
PB: predicated region body
PF: predicated region fallthrough
CT: control target
= control target key end

     0   :  { %10 = vsyncpa [#allocation3], 0  ;;  %s385_s0 = inlined_call_operand.hbm [shape: f32[8,10], index: 0, kind: input, shape index: {}]   ;;  %s386_s1 = inlined_call_operand.vmem [shape: f32[1,10], index: 1, kind: input, shape index: {}]   ;;  %s387_s2 = inlined_call_operand.vmem [shape: f32[1,10], index: 2, kind: input, shape index: {}]   ;;  %s388_s3 = inlined_call_operand.hbm [shape: f32[10,50], index: 3, kind: input, shape index: {}]   ;;  %s389_s4 = inlined_call_operand.vmem [shape: f32[1,50], index: 4, kind: input, shape index: {}]   ;;  %s390_s5 = inlined_call_operand.hbm [shape: f32[8,50], index: 5, kind: output, shape index: {}]  }
   0x1   :  { %11 = vsyncpa [#allocation6], 0 }
   0x2   :  { %12 = vsyncpa [#allocation4], 0  ;;  %s291_s18 = smov [#allocation2]   ;;  %s292_s20 = smov [#allocation5]  }
   0x3   :  { %s19_s19 = sshll.u32 %s291_s18, 4  ;;  %s32_s21 = sshll.u32 %s292_s20, 4  ;;  %s20_s19 = int_to_ptr.vmem [resolvable:$true] %s19_s19  ;;  %s330_s21 = int_to_ptr.vmem [resolvable:$true] %s32_s21 }
   0x4   :  { %s219_s24 = scalar_lea.hbm %s385_s0, 128 }
   0x5   :  { %p220_p0 = scmp.ne.s32.totalorder %s385_s0, %s219_s24  ;;  %p223_p1 = scmp.lt.u32.totalorder %s219_s24, %s385_s0 }
   0x7   :  { %p225_p2 = pnand %p223_p1, %p220_p0 }
   0x9   :  { %228 = shalt.err (!%p225_p2)
}
   0xa   :  { %s229_s29 = scalar_lea.vmem %s20_s19, 128  ;;  %p234_p4 = scmp.lt.s32.totalorder %s20_s19, %s20_s19 }
   0xb   :  { %p230_p3 = scmp.ne.s32.totalorder %s20_s19, %s229_s29  ;;  %p235_p5 = scmp.lt.s32.totalorder %s229_s29, %s229_s29 }
   0xd   :  { %p236_p6 = por %p235_p5, %p234_p4 }
   0xf   :  { %p237_p7 = pnand %p236_p6, %p230_p3 }
  0x11   :  { %240 = shalt.err (!%p237_p7)
}
  0x12   :  { %22 = dma.hbm_to_vmem [thread:$0]  %s385_s0, 128, %s20_s19, [#allocation3]  }
  0x13   :  { %s241_s9 = scalar_lea.hbm %s388_s3, 256 }
  0x14   :  { %p242_p8 = scmp.ne.s32.totalorder %s388_s3, %s241_s9  ;;  %p245_p9 = scmp.lt.u32.totalorder %s241_s9, %s388_s3 }
  0x16   :  { %p247_p10 = pnand %p245_p9, %p242_p8 }
  0x18   :  { %250 = shalt.err (!%p247_p10)
}
  0x19   :  { %s251_s14 = scalar_lea.vmem %s330_s21, 256  ;;  %p256_p12 = scmp.lt.s32.totalorder %s330_s21, %s330_s21 }
  0x1a   :  { %p252_p11 = scmp.ne.s32.totalorder %s330_s21, %s251_s14  ;;  %p257_p13 = scmp.lt.s32.totalorder %s251_s14, %s251_s14 }
  0x1c   :  { %p258_p0 = por %p257_p13, %p256_p12 }
  0x1e   :  { %p259_p1 = pnand %p258_p0, %p252_p11 }
  0x20   :  { %262 = shalt.err (!%p259_p1)
}
  0x21   :  { %s293_s0 = smov 128   ;;  %s294_s15 = smov 8  }
  0x22   :  { %38 = dma.hbm_to_vmem [thread:$0]  %s388_s3, 256, %s330_s21, [#allocation6], %s293_s0, %s293_s0, %s294_s15  }
  0x23   :  { %285 = dma.done.wait [#allocation3], 128  }
  0x24   :  { %286 = vsyncadd [#allocation3], 4294967168 }
  0x25   :  { %287 = dma.done.wait [#allocation6], 256  }
  0x26   :  { %288 = vsyncadd [#allocation6], 4294967040  ;;  %v295_v0 = vmov 0.0|0.0   ;;  %vm296_vm0 = vmmov 0   ;;  %v297_v1 = vmov 0.0   ;;  %vm98_vm1 = vcmask 1041408  }
  0x27   :  { %204 = vmatprep.subr.bf16.mxu0 %v295_v0  ;;  %201 = vmatprep.mubr.msk.f32.mxu0 %vm296_vm0, %v297_v1  ;;  %vm50_vm2 = vcmask 80896   ;;  %vm298_vm3 = vmmov 1   ;;  %v86_v2 = vld [vmem:[#allocation5] sm:$0xff]  ;;  %v87_v3 = vld [vmem:[#allocation5 + $0x8] sm:$0x3]  ;;  %v47_v4 = vld [vmem:[#allocation2] sm:$0xff]  ;;  %v73_v25 = vlaneseq }
  0x28   :  { %vm206_vm4 = vmpackc.low %vm98_vm1, %vm298_vm3  ;;  %v205_v5 = vpack.c.bf16 %v87_v3, %v86_v2  ;;  %v51_v6 = vsel %vm50_vm2, %v47_v4, 0.0  ;;  %v48_v27 = vld [vmem:[%s386_s1] sm:$0x1]  ;;  %s299_s23 = smov [#allocation7]   ;;  %vm172_vm5 = vcmask 408576  }
  0x29   :  { %v52_v7 = vrot.slane %v51_v6, 4  ;;  %v74_v26 = vshrl.u32 %v73_v25, 7  ;;  %v190_v32 = vld [vmem:[%s387_s2] ss:$0 sm:$0xff]  ;;  %s180_s24 = sshll.u32 %s299_s23, 4  ;;  %s181_s24 = int_to_ptr.vmem [resolvable:$true] %s180_s24 }
  0x2a   :  { %207 = vmatpush3.bf16.msk.msra.mxu0 %vm206_vm4, %v205_v5  ;;  %v191_v36 = vld [vmem:[%s389_s4] ss:$0 sm:$0xff]  ;;  %s263_s1 = scalar_lea.vmem %s181_s24, 128  ;;  %p268_p3 = scmp.lt.s32.totalorder %s181_s24, %s181_s24 }
  0x2b   :  { %v53_v8 = vadd.f32 %v52_v7, %v51_v6  ;;  %v75_v28 = vsub.s32 0, %v74_v26  ;;  %p264_p2 = scmp.ne.s32.totalorder %s181_s24, %s263_s1  ;;  %p269_p4 = scmp.lt.s32.totalorder %s263_s1, %s263_s1 }
  0x2d   :  { %v54_v9 = vrot.slane %v53_v8, 2  ;;  %p270_p5 = por %p269_p4, %p268_p3 }
  0x2f   :  { %v55_v10 = vadd.f32 %v54_v9, %v53_v8  ;;  %p271_p6 = pnand %p270_p5, %p264_p2 }
  0x31   :  { %v56_v11 = vrot.slane %v55_v10, 1 }
  0x33   :  { %v57_v12 = vadd.f32 %v56_v11, %v55_v10 }
  0x35   :  { %v59_v13 = vmul.f32 0.125, %v57_v12 }
  0x37   :  { %v60_v14 = vsub.f32 %v47_v4, %v59_v13 }
  0x39   :  { %v61_v15 = vmul.f32 %v60_v14, %v60_v14 }
  0x3b   :  { %v62_v16 = vsel %vm50_vm2, %v61_v15, 0.0 }
  0x3c   :  { %v63_v17 = vrot.slane %v62_v16, 4 }
  0x3e   :  { %v64_v18 = vadd.f32 %v63_v17, %v62_v16 }
  0x40   :  { %v65_v19 = vrot.slane %v64_v18, 2 }
  0x42   :  { %v66_v20 = vadd.f32 %v65_v19, %v64_v18 }
  0x44   :  { %v67_v21 = vrot.slane %v66_v20, 1 }
  0x46   :  { %v68_v22 = vadd.f32 %v67_v21, %v66_v20 }
  0x48   :  { %v69_v23 = vmul.f32 0.125, %v68_v22 }
  0x4a   :  { %v70_v24 = vadd.f32 1e-05, %v69_v23 }
  0x4c   :  { %217 = vrsqrt.f32 %v70_v24 }
  0x56   :  { %v218_v29 = vpop.eup %217 }
  0x57   :  { %v72_v30 = vmul.f32 %v218_v29, %v48_v27 }
  0x59   :  { %v76_v31 = vrot.slane %v72_v30, %v75_v28 }
  0x5b   :  { %v77_v33 = vmul.f32 %v76_v31, %v60_v14 }
  0x5d   :  { %v84_v34 = vadd.f32 %v190_v32, %v77_v33 }
  0x5f   :  { %v85_v35 = vmax.f32 %v84_v34, 0.0 }
  0x61   :  { %202 = vmatmul.mubr.msk.f32.vlgmr.msra.gmra.mrb[0].mxu0 %vm50_vm2, %v85_v35 }
 0x134   :  { %v168_v37 = vpop.f32.mrb[0].mxu0 }
 0x135   :  { %v169_v38 = vadd.f32 %v191_v36, %v168_v37  ;;  %v203_v39 = vpop.f32.mrb[1].mxu0 }
 0x137   :  { %173 = vst.msk [vmem:[#allocation7] sm:$0xff] %vm172_vm5, %v169_v38 }
 0x138   :  { %274 = shalt.err (!%p271_p6)
}
 0x139   :  { %s275_s26 = scalar_lea.hbm %s390_s5, 128 }
 0x13a   :  { %p276_p7 = scmp.ne.s32.totalorder %s390_s5, %s275_s26  ;;  %p279_p8 = scmp.lt.u32.totalorder %s275_s26, %s390_s5 }
 0x13c   :  { %p281_p9 = pnand %p279_p8, %p276_p7 }
 0x13e   :  { %284 = shalt.err (!%p281_p9)
}
 0x13f   :  { %183 = dma.vmem_to_hbm [thread:$0]  %s181_s24, 128, %s390_s5, [#allocation4]  }
 0x140   :  { %289 = dma.done.wait [#allocation4], 128  }
 0x141   :  { %290 = vsyncadd [#allocation4], 4294967168 }
 0x142   :  { %187 = vsyncpa [#allocation3], 1 }
 0x143   :  { %188 = vsyncpa [#allocation6], 1 }
 0x144   :  { %189 = vsyncpa [#allocation4], 1 }

</bundles_post_ra>
